<compile_context>
chip_gen: v5e
topology: v5e:2x2
jax: 0.10.0
libtpu: 0.0.40
codegen_flags: <defaults>
</compile_context>

<pallas_src>
import functools
import math

import jax
import jax.numpy as jnp
from jax.experimental import pallas as pl
from jax.experimental.pallas import tpu as pltpu


_LANES = 128
# Combined (input + output) tile bytes per grid step.  Double buffering of both
# sides makes the peak pipeline footprint ~2x this, i.e. ~4 MiB by default.
_DEFAULT_TILE_BYTES = 2 * 1024 * 1024


def _packing(dtype) -> int:
    """Sublane packing factor: 1 for 32-bit, 2 for 16-bit, 4 for 8-bit dtypes."""
    return max(1, 4 // jnp.dtype(dtype).itemsize)


def _round_up(a: int, m: int) -> int:
    return ((a + m - 1) // m) * m


def _dense_group_size(in_dim: int, out_dim: int) -> int:
    """Smallest G with G*in_dim % 128 == 0 and G*out_dim % 128 == 0."""
    g_in = _LANES // math.gcd(in_dim, _LANES)
    g_out = _LANES // math.gcd(out_dim, _LANES)
    return (g_in * g_out) // math.gcd(g_in, g_out)


def _rows_per_tile(n_rows: int, bytes_per_row: int, sublane_multiple: int,
                   tile_bytes: int) -> int:
    """Rows per grid step: biggest tile under the byte target, dtype-aware rounding."""
    rows = max(1, tile_bytes // max(bytes_per_row, 1))
    if rows >= n_rows:
        return n_rows                      # full-extent block: always legal
    rows = max(sublane_multiple, (rows // sublane_multiple) * sublane_multiple)
    return min(rows, n_rows)


# ----------------------------- kernels ---------------------------------------


def _zero_pad_dense_kernel(x_ref, o_ref, *, groups, in_dim, out_dim):
    """Lane-dense path.

    x_ref: (TB, groups*in_dim), o_ref: (TB, groups*out_dim); both widths are
    multiples of 128 so the VMEM tiles are unpadded and both DMAs are dense.
    Each "group row" packs `groups` consecutive logical rows; logical row g's
    features move from lanes [g*in_dim, (g+1)*in_dim) to lanes
    [g*out_dim, g*out_dim+in_dim), the rest of the tile is zero.
    """
    # One dense, unmasked full-tile zero store ...
    o_ref[...] = jnp.zeros_like(o_ref)
    x = x_ref[...]
    # ... then drop each packed row's features into place with static slice
    # stores.  The lane shifts/masked stores are VMEM-side only and overlap
    # with the HBM DMAs of neighbouring grid steps.
    for g in range(groups):
        o_ref[:, g * out_dim:g * out_dim + in_dim] = (
            x[:, g * in_dim:(g + 1) * in_dim]
        )


def _zero_pad_rows_kernel(x_ref, o_ref, *, in_dim):
    """Fallback path (N not divisible by the group size): plain row tiles."""
    o_ref[:, :in_dim] = x_ref[...]
    o_ref[:, in_dim:] = jnp.zeros(
        (o_ref.shape[0], o_ref.shape[1] - in_dim), dtype=o_ref.dtype
    )


# ----------------------------- wrapper ----------------------------------------


def zero_pad_layer(x: jax.Array, out_dim: int, *,
                   tile_bytes: int = _DEFAULT_TILE_BYTES) -> jax.Array:
    """Pallas implementation of ZeroPadLayer.forward: (N, in_dim) -> (N, out_dim)."""
    n, in_dim = x.shape
    assert out_dim > in_dim, "ZeroPadLayer requires out_dim > in_dim"

    dtype = x.dtype
    itemsize = jnp.dtype(dtype).itemsize
    sublane_multiple = 8 * _packing(dtype)   # 8 f32 / 16 bf16 / 32 int8

    cost = pl.CostEstimate(
        flops=0, transcendentals=0,
        bytes_accessed=itemsize * n * (in_dim + out_dim))
    # Row tiles are independent -> shard across v7x's two TensorCores.  If
    # xprof ever shows a single TC issuing all DMAs, switch this grid axis to
    # pltpu.CORE_PARALLEL.
    cparams = pltpu.CompilerParams(dimension_semantics=("parallel",))

    groups = _dense_group_size(in_dim, out_dim)
    # Keep the in-kernel unrolled loop (and block widths) reasonable.
    use_dense = (n % groups == 0) and (groups <= 64)

    if use_dense:
        ng = n // groups
        w_in = groups * in_dim
        w_out = groups * out_dim
        tb = _rows_per_tile(ng, (w_in + w_out) * itemsize,
                            sublane_multiple, tile_bytes)
        xg = x.reshape(ng, w_in)                       # free row-major view
        kern = functools.partial(
            _zero_pad_dense_kernel,
            groups=groups, in_dim=in_dim, out_dim=out_dim)
        out = pl.pallas_call(
            kern,
            out_shape=jax.ShapeDtypeStruct((ng, w_out), dtype),
            grid_spec=pl.GridSpec(
                grid=(pl.cdiv(ng, tb),),
                in_specs=[pl.BlockSpec((tb, w_in), lambda i: (i, 0))],
                out_specs=pl.BlockSpec((tb, w_out), lambda i: (i, 0)),
            ),
            compiler_params=cparams,
            cost_estimate=cost,
        )(xg)
        return out.reshape(n, out_dim)                 # free row-major view

    # Fallback: row-tiled, lane-sparse blocks (correct, a bit slower).  Budget
    # VMEM with lane-padded widths: a (*, d) block with d < 128 is physically
    # padded to 128 lanes in the VMEM tile.
    padded_row_bytes = (
        _round_up(in_dim, _LANES) + _round_up(out_dim, _LANES)) * itemsize
    tn = _rows_per_tile(n, padded_row_bytes, sublane_multiple, tile_bytes)
    kern = functools.partial(_zero_pad_rows_kernel, in_dim=in_dim)
    return pl.pallas_call(
        kern,
        out_shape=jax.ShapeDtypeStruct((n, out_dim), dtype),
        grid_spec=pl.GridSpec(
            grid=(pl.cdiv(n, tn),),
            in_specs=[pl.BlockSpec((tn, in_dim), lambda i: (i, 0))],
            out_specs=pl.BlockSpec((tn, out_dim), lambda i: (i, 0)),
        ),
        compiler_params=cparams,
        cost_estimate=cost,
    )(x)


def _reference(x: jax.Array, out_dim: int) -> jax.Array:
    n, in_dim = x.shape
    return jnp.concatenate(
        [x, jnp.zeros((n, out_dim - in_dim), dtype=x.dtype)], axis=1)


if __name__ == "__main__":
    IN_DIM, OUT_DIM = 16, 32

    # 1) Tiny batch (module-scale): lane-dense path, single full-extent block.
    x1 = jax.random.normal(jax.random.PRNGKey(0), (8, IN_DIM), dtype=jnp.float32)
    y1 = jax.block_until_ready(zero_pad_layer(x1, OUT_DIM))
    assert y1.shape == (8, OUT_DIM) and y1.dtype == jnp.float32
    assert jnp.array_equal(y1, _reference(x1, OUT_DIM))

    # 2) Lane-dense path with several grid steps and a partial trailing block
    #    (tile budget shrunk so the pipeline actually iterates at this small N).
    x2 = jax.random.normal(jax.random.PRNGKey(0), (2056, IN_DIM), dtype=jnp.float32)
    y2 = jax.block_until_ready(zero_pad_layer(x2, OUT_DIM, tile_bytes=16 * 1024))
    assert jnp.array_equal(y2, _reference(x2, OUT_DIM))

    # 3) Batch not divisible by the group size (8) -> row-tiled fallback path,
    #    also with a partial trailing block.
    x3 = jax.random.normal(jax.random.PRNGKey(0), (2500, IN_DIM), dtype=jnp.float32)
    y3 = jax.block_until_ready(zero_pad_layer(x3, OUT_DIM))
    assert jnp.array_equal(y3, _reference(x3, OUT_DIM))

    # 4) bf16: exercises dtype-aware sublane rounding and the packed-lane path.
    x4 = jax.random.normal(jax.random.PRNGKey(1), (256, IN_DIM), dtype=jnp.bfloat16)
    y4 = jax.block_until_ready(zero_pad_layer(x4, OUT_DIM))
    assert y4.dtype == jnp.bfloat16
    assert jnp.array_equal(y4, _reference(x4, OUT_DIM))

    print("KERNEL_OK")
</pallas_src>

<mosaic_0001>
module attributes {stable_mosaic.version = 11 : i64} {
  func.func @_zero_pad_dense_kernel(%arg0: i32, %arg1: memref<1x128xf32, #tpu.memory_space<vmem>>, %arg2: memref<1x256xf32, #tpu.memory_space<vmem>>) attributes {dimension_semantics = [#tpu.dimension_semantics<parallel>], iteration_bounds = array<i64: 1>, scalar_prefetch = 0 : i64, scratch_operands = 0 : i64, tpu.core_type = #tpu.core_type<tc>, window_params = [{transform_indices = @transform_0, window_bounds = array<i64: 1, 128>}, {transform_indices = @transform_1, window_bounds = array<i64: 1, 256>}]} {
    %cst = arith.constant 0.000000e+00 : f32
    %0 = vector.broadcast %cst : f32 to vector<1x256xf32>
    %c0 = arith.constant 0 : index
    %c0_0 = arith.constant 0 : index
    %1 = vector.load %arg2[%c0, %c0_0] : memref<1x256xf32, #tpu.memory_space<vmem>>, vector<1x256xf32>
    tpu.vector_store %arg2[%c0, %c0_0], %0 {strides = array<i32>} : memref<1x256xf32, #tpu.memory_space<vmem>>, vector<1x256xf32>,
    %c0_1 = arith.constant 0 : index
    %c0_2 = arith.constant 0 : index
    %2 = vector.load %arg1[%c0_1, %c0_2] : memref<1x128xf32, #tpu.memory_space<vmem>>, vector<1x128xf32>
    %3 = vector.extract_strided_slice %2 {offsets = [0, 0], sizes = [1, 16], strides = [1, 1]} : vector<1x128xf32> to vector<1x16xf32>
    %c0_3 = arith.constant 0 : index
    %c0_4 = arith.constant 0 : index
    %4 = vector.load %arg2[%c0_3, %c0_4] : memref<1x256xf32, #tpu.memory_space<vmem>>, vector<1x16xf32>
    tpu.vector_store %arg2[%c0_3, %c0_4], %3 {strides = array<i32>} : memref<1x256xf32, #tpu.memory_space<vmem>>, vector<1x16xf32>,
    %5 = vector.extract_strided_slice %2 {offsets = [0, 16], sizes = [1, 16], strides = [1, 1]} : vector<1x128xf32> to vector<1x16xf32>
    %c0_5 = arith.constant 0 : index
    %c32 = arith.constant 32 : index
    %6 = vector.load %arg2[%c0_5, %c32] : memref<1x256xf32, #tpu.memory_space<vmem>>, vector<1x16xf32>
    tpu.vector_store %arg2[%c0_5, %c32], %5 {strides = array<i32>} : memref<1x256xf32, #tpu.memory_space<vmem>>, vector<1x16xf32>,
    %7 = vector.extract_strided_slice %2 {offsets = [0, 32], sizes = [1, 16], strides = [1, 1]} : vector<1x128xf32> to vector<1x16xf32>
    %c0_6 = arith.constant 0 : index
    %c64 = arith.constant 64 : index
    %8 = vector.load %arg2[%c0_6, %c64] : memref<1x256xf32, #tpu.memory_space<vmem>>, vector<1x16xf32>
    tpu.vector_store %arg2[%c0_6, %c64], %7 {strides = array<i32>} : memref<1x256xf32, #tpu.memory_space<vmem>>, vector<1x16xf32>,
    %9 = vector.extract_strided_slice %2 {offsets = [0, 48], sizes = [1, 16], strides = [1, 1]} : vector<1x128xf32> to vector<1x16xf32>
    %c0_7 = arith.constant 0 : index
    %c96 = arith.constant 96 : index
    %10 = vector.load %arg2[%c0_7, %c96] : memref<1x256xf32, #tpu.memory_space<vmem>>, vector<1x16xf32>
    tpu.vector_store %arg2[%c0_7, %c96], %9 {strides = array<i32>} : memref<1x256xf32, #tpu.memory_space<vmem>>, vector<1x16xf32>,
    %11 = vector.extract_strided_slice %2 {offsets = [0, 64], sizes = [1, 16], strides = [1, 1]} : vector<1x128xf32> to vector<1x16xf32>
    %c0_8 = arith.constant 0 : index
    %c128 = arith.constant 128 : index
    %12 = vector.load %arg2[%c0_8, %c128] : memref<1x256xf32, #tpu.memory_space<vmem>>, vector<1x16xf32>
    tpu.vector_store %arg2[%c0_8, %c128], %11 {strides = array<i32>} : memref<1x256xf32, #tpu.memory_space<vmem>>, vector<1x16xf32>,
    %13 = vector.extract_strided_slice %2 {offsets = [0, 80], sizes = [1, 16], strides = [1, 1]} : vector<1x128xf32> to vector<1x16xf32>
    %c0_9 = arith.constant 0 : index
    %c160 = arith.constant 160 : index
    %14 = vector.load %arg2[%c0_9, %c160] : memref<1x256xf32, #tpu.memory_space<vmem>>, vector<1x16xf32>
    tpu.vector_store %arg2[%c0_9, %c160], %13 {strides = array<i32>} : memref<1x256xf32, #tpu.memory_space<vmem>>, vector<1x16xf32>,
    %15 = vector.extract_strided_slice %2 {offsets = [0, 96], sizes = [1, 16], strides = [1, 1]} : vector<1x128xf32> to vector<1x16xf32>
    %c0_10 = arith.constant 0 : index
    %c192 = arith.constant 192 : index
    %16 = vector.load %arg2[%c0_10, %c192] : memref<1x256xf32, #tpu.memory_space<vmem>>, vector<1x16xf32>
    tpu.vector_store %arg2[%c0_10, %c192], %15 {strides = array<i32>} : memref<1x256xf32, #tpu.memory_space<vmem>>, vector<1x16xf32>,
    %17 = vector.extract_strided_slice %2 {offsets = [0, 112], sizes = [1, 16], strides = [1, 1]} : vector<1x128xf32> to vector<1x16xf32>
    %c0_11 = arith.constant 0 : index
    %c224 = arith.constant 224 : index
    %18 = vector.load %arg2[%c0_11, %c224] : memref<1x256xf32, #tpu.memory_space<vmem>>, vector<1x16xf32>
    tpu.vector_store %arg2[%c0_11, %c224], %17 {strides = array<i32>} : memref<1x256xf32, #tpu.memory_space<vmem>>, vector<1x16xf32>,
    return
  }
  func.func @transform_0(%arg0: i32) -> (i32, i32) {
    %c0_i32 = arith.constant 0 : i32
    %c0_i32_0 = arith.constant 0 : i32
    return %arg0, %c0_i32 : i32, i32
  }
  func.func @transform_1(%arg0: i32) -> (i32, i32) {
    %c0_i32 = arith.constant 0 : i32
    %c0_i32_0 = arith.constant 0 : i32
    return %arg0, %c0_i32 : i32, i32
  }
}

</mosaic_0001>

<bundles_post_ra>
// kernel: tpu_custom_call.1
= control target key start
LH: loop header
LB: loop body
LE: loop exit
PB: predicated region body
PF: predicated region fallthrough
CT: control target
= control target key end

     0   :  { %6 = vsyncpa [#allocation3], 0  ;;  %s213_s0 = inlined_call_operand.hbm [shape: f32[1,128], index: 0, kind: input, shape index: {}]   ;;  %s214_s1 = inlined_call_operand.hbm [shape: f32[1,256], index: 1, kind: output, shape index: {}]  }
   0x1   :  { %7 = vsyncpa [#allocation4], 0  ;;  %s13_s8 = sshll.u32 %s213_s0, 4  ;;  %s149_s9 = smov [#allocation2]   ;;  %s14_s8 = int_to_ptr.hbm [resolvable:$true] %s13_s8 }
   0x2   :  { %s15_s10 = sshll.u32 %s149_s9, 4  ;;  %s16_s10 = int_to_ptr.vmem [resolvable:$true] %s15_s10 }
   0x3   :  { %18 = dma.hbm_to_vmem [thread:$0]  %s14_s8, 16, %s16_s10, [#allocation3]  }
   0x4   :  { %145 = dma.done.wait [#allocation3], 16  }
   0x5   :  { %146 = vsyncadd [#allocation3], 4294967280  ;;  %v23_v0 = vlaneseq  ;;  %v150_v1 = vmov 0.0   ;;  %v28_v2 = vld [vmem:[#allocation2] sm:$0x1]  ;;  %s151_s11 = smov 64  }
   0x6   :  { %54 = vrot.lane.b32.xlu0 %v28_v2, %s151_s11  ;;  %s152_s12 = smov 80   ;;  %s153_s0 = smov 96  }
   0x7   :  { %vm25_vm0 = vcmp.lt.s32.totalorder %v23_v0, 256  ;;  %vm172_vm1 = vcmp.lt.s32.totalorder %v23_v0, 16  ;;  %58 = vrot.lane.b32.xlu1 %v28_v2, %s152_s12  ;;  %62 = vrot.lane.b32.xlu2 %v28_v2, %s153_s0  ;;  %s154_s13 = smov 16   ;;  %s155_s14 = smov 32   ;;  %vm178_vm2 = vcmp.ge.s32.totalorder %v23_v0, 32  ;;  %vm182_vm3 = vcmp.lt.s32.totalorder %v23_v0, 48 }
   0x8   :  { %27 = vst.msk [vmem:[#allocation5] sm:$0x3] %vm25_vm0, %v150_v1  ;;  %s156_s15 = smov 48   ;;  %s157_s16 = smov 112   ;;  %vm186_vm4 = vcmp.ge.s32.totalorder %v23_v0, 64  ;;  %vm190_vm5 = vcmp.lt.s32.totalorder %v23_v0, 80  ;;  %vm38_vm6 = vmand %vm178_vm2, %vm182_vm3 }
   0x9   :  { %31 = vst.msk [vmem:[#allocation5] sm:$0x1] %vm172_vm1, %v28_v2  ;;  %vm45_vm7 = vmand %vm186_vm4, %vm190_vm5  ;;  %vm204_vm8 = vcmp.ge.s32.totalorder %v23_v0, 96  ;;  %vm51_vm9 = vcmp.lt.s32.totalorder %v23_v0, 112  ;;  %s158_s17 = smov [#allocation5]   ;;  %s77_s21 = sshll.u32 %s214_s1, 4  ;;  %s78_s21 = int_to_ptr.hbm [resolvable:$true] %s77_s21 }
   0xa   :  { %vm52_vm10 = vmand %vm204_vm8, %vm51_vm9  ;;  %s75_s18 = sshll.u32 %s158_s17, 4  ;;  %s76_s18 = int_to_ptr.vmem [resolvable:$true] %s75_s18 }
   0xe   :  { %33 = vrot.lane.b32.xlu0 %v28_v2, %s154_s13 }
   0xf   :  { %40 = vrot.lane.b32.xlu1 %v28_v2, %s155_s14  ;;  %47 = vrot.lane.b32.xlu2 %v28_v2, %s156_s15 }
  0x16   :  { %66 = vrot.lane.b32.xlu0 %v28_v2, %s157_s16 }
  0x61   :  { %v63_v8 = vpop.permute.xlu2 %62 }
  0x69   :  { %v48_v12 = vpop.permute.xlu2 %47 }
  0x78   :  { %v55_v9 = vpop.permute.xlu0 %54 }
  0x79   :  { %v59_v10 = vpop.permute.xlu1 %58  ;;  %57 = vst.msk [vmem:[#allocation5 + $0x1] sm:$0x1] %vm172_vm1, %v55_v9 }
  0x7a   :  { %61 = vst.msk [vmem:[#allocation5 + $0x1] sm:$0x1] %vm38_vm6, %v59_v10 }
  0x7b   :  { %65 = vst.msk [vmem:[#allocation5 + $0x1] sm:$0x1] %vm45_vm7, %v63_v8 }
  0x80   :  { %v34_v13 = vpop.permute.xlu0 %33 }
  0x81   :  { %v41_v14 = vpop.permute.xlu1 %40  ;;  %39 = vst.msk [vmem:[#allocation5] sm:$0x1] %vm38_vm6, %v34_v13 }
  0x82   :  { %46 = vst.msk [vmem:[#allocation5] sm:$0x1] %vm45_vm7, %v41_v14 }
  0x83   :  { %53 = vst.msk [vmem:[#allocation5] sm:$0x1] %vm52_vm10, %v48_v12 }
  0x88   :  { %v67_v15 = vpop.permute.xlu0 %66 }
  0x89   :  { %69 = vst.msk [vmem:[#allocation5 + $0x1] sm:$0x1] %vm52_vm10, %v67_v15 }
  0x8a   :  { %80 = dma.vmem_to_hbm [thread:$0]  %s76_s18, 32, %s78_s21, [#allocation4]  }
  0x8b   :  { %147 = dma.done.wait [#allocation4], 32  }
  0x8c   :  { %148 = vsyncadd [#allocation4], 4294967264 }
  0x8d   :  { %85 = vsyncpa [#allocation3], 1 }
  0x8e   :  { %86 = vsyncpa [#allocation4], 1 }

</bundles_post_ra>
